<compile_context>
chip_gen: v6e
topology: v6e:2x2x1
jax: 0.10.0
libtpu: 0.0.40
codegen_flags: <defaults>
</compile_context>

<pallas_src>
import math
import functools

import numpy as np
import jax
import jax.numpy as jnp
from jax.experimental import pallas as pl
from jax.experimental.pallas import tpu as pltpu


# ----------------------------------------------------------------------------
# Generation-aware VMEM budgeting (v5e/v6e: 128 MiB, v7x: 64 MiB per TensorCore).
# ----------------------------------------------------------------------------
def _detect_vmem_capacity_bytes():
    try:
        info = pltpu.get_tpu_info()
        cap = getattr(info, "vmem_capacity_bytes", None)
        if cap:
            return int(cap)
    except Exception:
        pass
    return 64 * 1024 * 1024            # conservative default (v7x per-TC VMEM)


_VMEM_CAP = _detect_vmem_capacity_bytes()
_VMEM_LIMIT = max(32 * 1024 * 1024, (_VMEM_CAP * 3) // 4)   # ~96 MiB on 128 MiB parts, 48 MiB on v7x
_BLOCK_BUDGET = _VMEM_LIMIT // 2                            # budget for live (double-buffered) blocks


# ----------------------------------------------------------------------------
# Pallas kernel 1: 1x1 convolution ("the segmentation module").
#   out[n, :, s] = W @ x[n, :, s] + b   with the flattened spatial axis on lanes.
# ----------------------------------------------------------------------------
def _conv1x1_kernel(x_ref, w_ref, b_ref, o_ref):
    # x_ref: (1, C, T) native dtype; w_ref: (ncp, C); b_ref: (ncp, 1) f32; o_ref: (1, ncp, T) f32
    o_ref[0] = (
        jnp.dot(w_ref[...], x_ref[0], preferred_element_type=jnp.float32)
        + b_ref[...]
    )


def pallas_conv1x1(x_nchw, w, b):
    """x_nchw: (N, C, H, W); w: (nclass, C, 1, 1); b: (nclass,) -> (N, nclass, H, W) f32."""
    N, C, H, W = x_nchw.shape
    nclass = w.shape[0]
    HW = H * W

    # Native NCHW layout and native dtype: just merge H,W (no transpose, no wrapper f32 cast).
    x = x_nchw.reshape(N, C, HW)
    ncp = ((nclass + 7) // 8) * 8          # sublane-aligned class dim -> unmasked stores
    wm = w.reshape(nclass, C).astype(x.dtype)
    bm = b.reshape(nclass, 1).astype(jnp.float32)
    if ncp != nclass:
        wm = jnp.pad(wm, ((0, ncp - nclass), (0, 0)))
        bm = jnp.pad(bm, ((0, ncp - nclass), (0, 0)))

    # Lane tile sized against the VMEM budget, accounting for Pallas' 2x double buffering of
    # both the input block and the output block (plus the resident weights/bias).
    xb = x.dtype.itemsize
    resident = ncp * C * xb + ncp * 4
    per_lane = 2 * C * xb + 2 * ncp * 4
    max_tile = max(128, ((_BLOCK_BUDGET - resident) // max(1, per_lane)) // 128 * 128)
    col_tile = HW if HW <= max_tile else max_tile
    n_col = pl.cdiv(HW, col_tile)
    if N * n_col < 2 and HW >= 256:
        # give v7x's second TensorCore something to do
        col_tile = max(128, ((HW // 2) + 127) // 128 * 128)
        n_col = pl.cdiv(HW, col_tile)

    out = pl.pallas_call(
        _conv1x1_kernel,
        out_shape=jax.ShapeDtypeStruct((N, ncp, HW), jnp.float32),
        grid=(N, n_col),
        in_specs=[
            pl.BlockSpec((1, C, col_tile), lambda n, j: (n, 0, j)),
            pl.BlockSpec((ncp, C), lambda n, j: (0, 0)),
            pl.BlockSpec((ncp, 1), lambda n, j: (0, 0)),
        ],
        out_specs=pl.BlockSpec((1, ncp, col_tile), lambda n, j: (n, 0, j)),
        compiler_params=pltpu.CompilerParams(
            dimension_semantics=("parallel", "parallel"),
            vmem_limit_bytes=_VMEM_LIMIT,
        ),
    )(x, wm, bm)
    if ncp != nclass:
        out = out[:, :nclass, :]
    return out.reshape(N, nclass, H, W)


# ----------------------------------------------------------------------------
# Pallas kernel 2: bilinear resize (align_corners=False) as two matmuls over a
# block of (N*C) planes per grid step.
# ----------------------------------------------------------------------------
def _resize_kernel(rh_ref, x_ref, rwT_ref, o_ref):
    # rh: (Hout, Hin)  x: (P, Hin, Win)  rwT: (Win, Wout)  o: (P, Hout, Wout)
    P, Hin, Win = x_ref.shape
    Hout = rh_ref.shape[0]
    Wout = rwT_ref.shape[1]
    rh = rh_ref[...]
    rwT = rwT_ref[...]
    x = x_ref[...]
    if Hout * Win <= Hin * Wout:
        # H pass first (smaller intermediate): batched matmul over the plane axis,
        # then ONE MXU-filling (P*Hout, Win) @ (Win, Wout) matmul.
        rh_b = jnp.broadcast_to(rh, (P, Hout, Hin))
        tmp = jnp.einsum("pij,pjk->pik", rh_b, x,
                         preferred_element_type=jnp.float32).astype(x.dtype)
        out = jnp.dot(tmp.reshape(P * Hout, Win), rwT,
                      preferred_element_type=jnp.float32)
        o_ref[...] = out.reshape(P, Hout, Wout).astype(o_ref.dtype)
    else:
        # W pass first as one MXU-filling (P*Hin, Win) @ (Win, Wout) matmul,
        # then the batched H pass.
        tmp = jnp.dot(x.reshape(P * Hin, Win), rwT,
                      preferred_element_type=jnp.float32).astype(x.dtype)
        tmp = tmp.reshape(P, Hin, Wout)
        rh_b = jnp.broadcast_to(rh, (P, Hout, Hin))
        out = jnp.einsum("pij,pjk->pik", rh_b, tmp,
                         preferred_element_type=jnp.float32)
        o_ref[...] = out.astype(o_ref.dtype)


@functools.lru_cache(maxsize=None)
def _bilinear_matrix(out_size, in_size):
    """Interpolation matrix matching PyTorch F.interpolate bilinear, align_corners=False."""
    d = np.arange(out_size, dtype=np.float64)
    src = np.clip((d + 0.5) * (in_size / out_size) - 0.5, 0.0, in_size - 1)
    i0 = np.floor(src).astype(np.int64)
    i1 = np.minimum(i0 + 1, in_size - 1)
    frac = (src - i0).astype(np.float32)
    R = np.zeros((out_size, in_size), np.float32)
    rows = d.astype(np.int64)
    np.add.at(R, (rows, i0), 1.0 - frac)
    np.add.at(R, (rows, i1), frac)
    return R


@functools.lru_cache(maxsize=None)
def _bilinear_matrices_device(out_h, in_h, out_w, in_w, dtype):
    rh = jnp.asarray(_bilinear_matrix(out_h, in_h), dtype=dtype)
    rwT = jnp.asarray(_bilinear_matrix(out_w, in_w).T, dtype=dtype)
    return rh, rwT


def pallas_resize_bilinear(x, out_h, out_w):
    """x: (N, C, Hin, Win) -> (N, C, out_h, out_w), same dtype as x."""
    N, C, Hin, Win = x.shape
    NC = N * C
    out_h, out_w = int(out_h), int(out_w)
    mat_dtype = jnp.bfloat16 if x.dtype == jnp.bfloat16 else jnp.float32
    mb = 2 if mat_dtype == jnp.bfloat16 else 4
    rh, rwT = _bilinear_matrices_device(out_h, int(Hin), out_w, int(Win), mat_dtype)
    xp = x.reshape(NC, Hin, Win)

    # VMEM accounting: 2x double-buffered in/out blocks + f32 intermediate
    # + per-plane broadcast of rh + resident interpolation matrices.
    xb = x.dtype.itemsize
    inter = min(out_h * Win, Hin * out_w)
    per_plane = (2 * Hin * Win * xb + 2 * out_h * out_w * xb
                 + inter * 4 + out_h * Hin * mb)
    resident = (out_h * Hin + Win * out_w) * mb
    P = int(max(1, min(NC, (_BLOCK_BUDGET - resident) // max(1, per_plane))))
    if NC >= 2:
        P = min(P, (NC + 1) // 2)      # >=2 grid steps -> both v7x TensorCores engaged
    n_blk = pl.cdiv(NC, P)

    out = pl.pallas_call(
        _resize_kernel,
        out_shape=jax.ShapeDtypeStruct((NC, out_h, out_w), x.dtype),
        grid=(n_blk,),
        in_specs=[
            pl.BlockSpec((out_h, Hin), lambda i: (0, 0)),
            pl.BlockSpec((P, Hin, Win), lambda i: (i, 0, 0)),
            pl.BlockSpec((Win, out_w), lambda i: (0, 0)),
        ],
        out_specs=pl.BlockSpec((P, out_h, out_w), lambda i: (i, 0, 0)),
        compiler_params=pltpu.CompilerParams(
            dimension_semantics=("parallel",),
            vmem_limit_bytes=_VMEM_LIMIT,
        ),
    )(rh, xp, rwT)
    return out.reshape(N, C, out_h, out_w)


# ----------------------------------------------------------------------------
# Pallas kernel 3: K-input elementwise add (multi-scale score merge) — avoids
# materializing a stacked (K, ...) tensor in HBM.
# ----------------------------------------------------------------------------
def _make_add_n_kernel(k):
    def kernel(*refs):
        o_ref = refs[k]
        acc = refs[0][...]
        for r in refs[1:k]:
            acc = acc + r[...]
        o_ref[...] = acc
    return kernel


def pallas_add_n(arrays):
    arrays = list(arrays)
    k = len(arrays)
    if k == 1:
        return arrays[0].astype(jnp.float32)
    shape = arrays[0].shape
    arrs = [a.astype(jnp.float32) for a in arrays]

    # Fold trailing dims into the lane axis until it is reasonably wide (lane-dense stores).
    dims = list(shape) if shape else [1]
    L, i = 1, len(dims)
    while i > 1 and L < 512:
        i -= 1
        L *= int(dims[i])
    M = int(np.prod(dims[:i])) if i > 0 else 1
    flat = [a.reshape(M, L) for a in arrs]

    denom = 2 * (k + 1) * 4            # k inputs + 1 output, double-buffered, f32
    max_elems = max(1024, _BLOCK_BUDGET // denom)
    if L <= max_elems // 8:
        ct = L
    else:
        ct = max(128, (max_elems // 8) // 128 * 128)
    rt_cap = max(8, (max_elems // max(1, ct)) // 8 * 8)
    rt = M if M <= rt_cap else rt_cap
    if pl.cdiv(M, rt) * pl.cdiv(L, ct) < 2:
        if M >= 16:
            rt = max(8, ((M // 2) + 7) // 8 * 8)
        elif L >= 256 and ct == L:
            ct = max(128, ((L // 2) + 127) // 128 * 128)
    grid = (pl.cdiv(M, rt), pl.cdiv(L, ct))
    spec = pl.BlockSpec((rt, ct), lambda i, j: (i, j))

    out = pl.pallas_call(
        _make_add_n_kernel(k),
        out_shape=jax.ShapeDtypeStruct((M, L), jnp.float32),
        grid=grid,
        in_specs=[spec] * k,
        out_specs=spec,
        compiler_params=pltpu.CompilerParams(
            dimension_semantics=("parallel", "parallel"),
            vmem_limit_bytes=_VMEM_LIMIT,
        ),
    )(*flat)
    return out.reshape(shape)


# ----------------------------------------------------------------------------
# Plain-JAX glue, mirroring the PyTorch helper functions.
# ----------------------------------------------------------------------------
def crop_image(img, h0, h1, w0, w1):
    return img[:, :, h0:h1, w0:w1]


def h_flip_image(img):
    assert img.ndim == 4
    return jax.lax.rev(img, (3,))


def v_flip_image(img):
    assert img.ndim == 4
    # The original torch code builds the index list from size(3) (width) but applies it on
    # dim 2 (height); identical to a full height flip whenever H == W (true at all call sites).
    H, W = img.shape[2], img.shape[3]
    if H == W:
        return jax.lax.rev(img, (2,))
    # TODO(synk): faithful fallback to the original width-sized index list for H != W.
    idx = jnp.asarray(np.arange(W - 1, -1, -1))
    return jnp.take(img, idx, axis=2)


def module_inference(module_fn, image, flip=True):
    if flip:
        h_img = h_flip_image(image)
        v_img = v_flip_image(image)
        img = jnp.concatenate([image, h_img, v_img], axis=0)
        cat_output = module_fn(img)
        B = image.shape[0]
        output = cat_output[:B]
        h_output = cat_output[B:2 * B]
        v_output = cat_output[2 * B:3 * B]
        # Let XLA fuse rev + rev + add + add into ONE pass over the score slab; a stacked
        # tensor + sum kernel would cost an extra full-slab HBM round trip.
        return output + h_flip_image(h_output) + v_flip_image(v_output)
    return module_fn(image)


def _pad_right_bottom(img, padh, padw, mode):
    """F.pad(img, (0, padw, 0, padh)) with torch semantics (negative pad crops)."""
    if padh < 0:
        img = img[:, :, : img.shape[2] + padh, :]
        padh = 0
    if padw < 0:
        img = img[:, :, :, : img.shape[3] + padw]
        padw = 0
    if padh == 0 and padw == 0:
        return img
    return jnp.pad(img, ((0, 0), (0, 0), (0, padh), (0, padw)), mode=mode)


def pad_image(img, crop_size):
    """crop_size: sequence [h, w] (or length-1)."""
    b, c, h, w = img.shape
    crop_size = np.asarray(crop_size).reshape(-1)
    if len(crop_size) > 1:
        padh = int(crop_size[0]) - h if h < int(crop_size[0]) else 0
        padw = int(crop_size[1]) - w if w < int(crop_size[1]) else 0
    else:
        padh = int(crop_size[0]) - h if h < int(crop_size[0]) else 0
        padw = int(crop_size[0]) - w if w < int(crop_size[0]) else 0
    min_padh = min(padh, h)
    min_padw = min(padw, w)
    if padw < w and padh < h:
        img_pad = _pad_right_bottom(img, padh, padw, "reflect")
    else:
        tmp = _pad_right_bottom(img, min_padh - 1, min_padw - 1, "reflect")
        img_pad = _pad_right_bottom(
            tmp, padh - min_padh + 1, padw - min_padw + 1, "constant"
        )
    if len(crop_size) > 1:
        assert img_pad.shape[2] >= crop_size[0] and img_pad.shape[3] >= crop_size[1]
    else:
        assert img_pad.shape[2] >= crop_size[0] and img_pad.shape[3] >= crop_size[0]
    return img_pad


def resize_image(img, h, w, **up_kwargs):
    if img.shape[2] == int(h) and img.shape[3] == int(w):
        # bilinear + align_corners=False with identical sizes is an exact identity.
        return img
    return pallas_resize_bilinear(img, int(h), int(w))


def _overlap_add_windows(out_b, batch, nclass, h_grids, w_grids, ph, pw, ch, cw, sh, sw):
    """Sum all sliding-window crop outputs into the (ph, pw) canvas and normalize by the
    (analytically computed) window count. out_b: (h_grids*w_grids*batch, nclass, ch, cw)."""
    out_b = out_b.astype(jnp.float32)

    # count_norm is fully static -> numpy, no device work; it is separable in h and w.
    count_h = np.zeros((ph,), np.float32)
    for idh in range(h_grids):
        h0 = idh * sh
        count_h[h0:min(h0 + ch, ph)] += 1.0
    count_w = np.zeros((pw,), np.float32)
    for idw in range(w_grids):
        w0 = idw * sw
        count_w[w0:min(w0 + cw, pw)] += 1.0
    count = count_h[:, None] * count_w[None, :]
    assert (count == 0).sum() == 0
    count_j = jnp.asarray(count)

    if ch % sh == 0 and cw % sw == 0:
        # k^2-band overlap-add: the G-window scatter collapses to kh*kw dense slice-adds.
        kh, kw = ch // sh, cw // sw
        Hc = (h_grids - 1) * sh + ch
        Wc = (w_grids - 1) * sw + cw
        ob = out_b.reshape(h_grids, w_grids, batch, nclass, kh, sh, kw, sw)
        canvas = jnp.zeros((batch, nclass, Hc, Wc), jnp.float32)
        for di in range(kh):
            for dj in range(kw):
                band = ob[:, :, :, :, di, :, dj, :]
                band = band.transpose(2, 3, 0, 4, 1, 5).reshape(
                    batch, nclass, h_grids * sh, w_grids * sw)
                canvas = canvas.at[:, :, di * sh:di * sh + h_grids * sh,
                                   dj * sw:dj * sw + w_grids * sw].add(band)
        outputs = canvas[:, :, :ph, :pw] / count_j
    else:
        # TODO(synk): Pallas scalar-prefetch scatter-add kernel for non-divisible strides.
        ob = out_b.reshape(h_grids, w_grids, batch, nclass, ch, cw)
        outputs = jnp.zeros((batch, nclass, ph, pw), jnp.float32)
        for idh in range(h_grids):
            for idw in range(w_grids):
                h0, w0 = idh * sh, idw * sw
                h1, w1 = min(h0 + ch, ph), min(w0 + cw, pw)
                outputs = outputs.at[:, :, h0:h1, w0:w1].add(
                    ob[idh, idw, :, :, :h1 - h0, :w1 - w0])
        outputs = outputs / count_j
    return outputs


# ----------------------------------------------------------------------------
# MultiEvalModule forward pass (multi-size evaluation).
# ----------------------------------------------------------------------------
class MultiEvalModulePallas:
    def __init__(self, module_fn, nclass, flip=True, scales=(1.0,), get_batch=1,
                 crop_size=(512, 512), stride_rate=1 / 2):
        self.module = module_fn
        self.nclass = nclass
        self.crop_size = np.array(crop_size)
        self.scales = scales
        self.flip = flip
        # TODO(synk): get_batch>1 micro-batching is subsumed by the fully-batched crop pass below.
        self.get_batch = get_batch
        self.stride_rate = stride_rate

    def forward(self, image):
        batch, _, h, w = image.shape
        stride_rate = self.stride_rate
        per_scale_scores = []
        for scale in self.scales:
            crop_size = self.crop_size
            stride = (crop_size * stride_rate).astype(np.int32)
            if h > w:
                long_size = int(math.ceil(h * scale))
                height = long_size
                width = int(1.0 * w * long_size / h + 0.5)
                short_size = width
            else:
                long_size = int(math.ceil(w * scale))
                width = long_size
                height = int(1.0 * h * long_size / w + 0.5)
                short_size = height
            cur_img = resize_image(image, height, width)
            if long_size <= int(np.max(crop_size)):
                pad_img = pad_image(cur_img, crop_size)
                outputs = module_inference(self.module, pad_img, self.flip)
                outputs = crop_image(outputs, 0, height, 0, width)
            else:
                if short_size < int(np.min(crop_size)):
                    pad_img = pad_image(cur_img, crop_size)
                else:
                    pad_img = cur_img
                _, _, ph, pw = pad_img.shape
                ch, cw = int(crop_size[0]), int(crop_size[1])
                sh, sw = int(stride[0]), int(stride[1])
                h_grids = int(math.ceil(1.0 * (ph - ch) / sh)) + 1
                w_grids = int(math.ceil(1.0 * (pw - cw) / sw)) + 1
                pad_img = pad_image(pad_img, [int(ph + ch), int(pw + cw)])

                # Gather every sliding-window crop and run the segmentation module
                # (with its flip variants) ONCE over a single big batch.
                crops, sizes = [], set()
                for idh in range(h_grids):
                    for idw in range(w_grids):
                        h0, w0 = idh * sh, idw * sw
                        crop_img = crop_image(pad_img, h0, h0 + ch, w0, w0 + cw)
                        pad_crop_img = pad_image(crop_img, crop_size)
                        sizes.add(tuple(int(s) for s in pad_crop_img.shape[-2:]))
                        crops.append(resize_image(pad_crop_img, ch, cw))
                assert len(sizes) == 1
                size_h, size_w = next(iter(sizes))

                batched = jnp.concatenate(crops, axis=0)             # (G*B, C, ch, cw)
                out_b = module_inference(self.module, batched, self.flip)
                out_b = resize_image(out_b, size_h, size_w)          # identity in practice
                assert tuple(int(s) for s in out_b.shape[-2:]) == (ch, cw)

                # Single accumulation + normalization pass over the canvas.
                outputs = _overlap_add_windows(out_b, batch, self.nclass,
                                               h_grids, w_grids, ph, pw,
                                               ch, cw, sh, sw)
                outputs = outputs[:, :, :height, :width]
            score = resize_image(outputs, h, w)
            per_scale_scores.append(score.astype(jnp.float32))
        if len(per_scale_scores) == 1:
            return per_scale_scores[0]
        return pallas_add_n(per_scale_scores)


# ----------------------------------------------------------------------------
# Demo
# ----------------------------------------------------------------------------
if __name__ == "__main__":
    key = jax.random.PRNGKey(0)
    k_img, k_w, k_b = jax.random.split(key, 3)

    B, C, H, W = 2, 4, 16, 16
    nclass = 5

    image = jax.random.normal(k_img, (B, C, H, W), jnp.float32)
    # Inner "segmentation module": deterministic 1x1 conv (C -> nclass) + bias.
    w_conv = 0.1 * jax.random.normal(k_w, (nclass, C, 1, 1), jnp.float32)
    b_conv = 0.1 * jax.random.normal(k_b, (nclass,), jnp.float32)

    def seg_module(x):
        return pallas_conv1x1(x, w_conv, b_conv)

    evaluator = MultiEvalModulePallas(
        seg_module,
        nclass=nclass,
        flip=True,
        scales=[1.0, 0.5],          # 1.0 exercises sliding-window path, 0.5 the whole-image path
        get_batch=1,
        crop_size=[8, 8],
        stride_rate=1 / 2,
    )

    forward = jax.jit(evaluator.forward)
    scores = jax.block_until_ready(forward(image))

    assert scores.shape == (B, nclass, H, W), scores.shape
    assert scores.dtype == jnp.float32
    assert bool(jnp.all(jnp.isfinite(scores)))
    print("KERNEL_OK")
</pallas_src>

<mosaic_0001>
module attributes {stable_mosaic.version = 11 : i64} {
  func.func @_conv1x1_kernel(%arg0: i32, %arg1: i32, %arg2: memref<1x4x64xf32, #tpu.memory_space<vmem>>, %arg3: memref<8x4xf32, #tpu.memory_space<vmem>>, %arg4: memref<8x1xf32, #tpu.memory_space<vmem>>, %arg5: memref<1x8x64xf32, #tpu.memory_space<vmem>>) attributes {dimension_semantics = [#tpu.dimension_semantics<parallel>, #tpu.dimension_semantics<parallel>], iteration_bounds = array<i64: 54, 1>, scalar_prefetch = 0 : i64, scratch_operands = 0 : i64, tpu.core_type = #tpu.core_type<tc>, window_params = [{transform_indices = @transform_0, window_bounds = array<i64: 1, 4, 64>}, {pipeline_mode = #tpu.pipeline_mode<synchronous>, transform_indices = @transform_1, window_bounds = array<i64: 8, 4>}, {pipeline_mode = #tpu.pipeline_mode<synchronous>, transform_indices = @transform_2, window_bounds = array<i64: 8, 1>}, {transform_indices = @transform_3, window_bounds = array<i64: 1, 8, 64>}]} {
    %c0 = arith.constant 0 : index
    %c0_0 = arith.constant 0 : index
    %0 = vector.load %arg3[%c0, %c0_0] : memref<8x4xf32, #tpu.memory_space<vmem>>, vector<8x4xf32>
    %c0_1 = arith.constant 0 : index
    %c0_2 = arith.constant 0 : index
    %c0_3 = arith.constant 0 : index
    %1 = vector.load %arg2[%c0_1, %c0_2, %c0_3] : memref<1x4x64xf32, #tpu.memory_space<vmem>>, vector<1x4x64xf32>
    %2 = vector.shape_cast %1 : vector<1x4x64xf32> to vector<4x64xf32>
    %cst = arith.constant dense<0.000000e+00> : vector<8x64xf32>
    %3 = tpu.matmul %0, %2, %cst {dimension_numbers = #tpu.dot_dimension_numbers<[1], [0], [0], [1], [0, 0, 1, 1], [], []>} : vector<8x4xf32>, vector<4x64xf32>, vector<8x64xf32> -> vector<8x64xf32>
    %c0_4 = arith.constant 0 : index
    %c0_5 = arith.constant 0 : index
    %4 = vector.load %arg4[%c0_4, %c0_5] : memref<8x1xf32, #tpu.memory_space<vmem>>, vector<8x1xf32>
    %5 = vector.broadcast %4 : vector<8x1xf32> to vector<8x64xf32>
    %6 = arith.addf %3, %5 : vector<8x64xf32>
    %c0_6 = arith.constant 0 : index
    %c0_7 = arith.constant 0 : index
    %c0_8 = arith.constant 0 : index
    %7 = vector.load %arg5[%c0_6, %c0_7, %c0_8] : memref<1x8x64xf32, #tpu.memory_space<vmem>>, vector<1x8x64xf32>
    %8 = vector.shape_cast %7 : vector<1x8x64xf32> to vector<8x64xf32>
    %9 = vector.shape_cast %6 : vector<8x64xf32> to vector<1x8x64xf32>
    tpu.vector_store %arg5[%c0_6, %c0_7, %c0_8], %9 {strides = array<i32>} : memref<1x8x64xf32, #tpu.memory_space<vmem>>, vector<1x8x64xf32>,
    return
  }
  func.func @transform_0(%arg0: i32, %arg1: i32) -> (i32, i32, i32) {
    %c0_i32 = arith.constant 0 : i32
    %c0_i32_0 = arith.constant 0 : i32
    return %arg0, %c0_i32, %arg1 : i32, i32, i32
  }
  func.func @transform_1(%arg0: i32, %arg1: i32) -> (i32, i32) {
    %c0_i32 = arith.constant 0 : i32
    %c0_i32_0 = arith.constant 0 : i32
    %c0_i32_1 = arith.constant 0 : i32
    return %c0_i32, %c0_i32_0 : i32, i32
  }
  func.func @transform_2(%arg0: i32, %arg1: i32) -> (i32, i32) {
    %c0_i32 = arith.constant 0 : i32
    %c0_i32_0 = arith.constant 0 : i32
    %c0_i32_1 = arith.constant 0 : i32
    return %c0_i32, %c0_i32_0 : i32, i32
  }
  func.func @transform_3(%arg0: i32, %arg1: i32) -> (i32, i32, i32) {
    %c0_i32 = arith.constant 0 : i32
    %c0_i32_0 = arith.constant 0 : i32
    return %arg0, %c0_i32, %arg1 : i32, i32, i32
  }
}

module attributes {stable_mosaic.version = 11 : i64} {
  func.func @_resize_kernel(%arg0: i32, %arg1: memref<8x16xf32, #tpu.memory_space<vmem>>, %arg2: memref<4x16x16xf32, #tpu.memory_space<vmem>>, %arg3: memref<16x8xf32, #tpu.memory_space<vmem>>, %arg4: memref<4x8x8xf32, #tpu.memory_space<vmem>>) attributes {dimension_semantics = [#tpu.dimension_semantics<parallel>], iteration_bounds = array<i64: 2>, scalar_prefetch = 0 : i64, scratch_operands = 0 : i64, tpu.core_type = #tpu.core_type<tc>, window_params = [{pipeline_mode = #tpu.pipeline_mode<synchronous>, transform_indices = @transform_0, window_bounds = array<i64: 8, 16>}, {transform_indices = @transform_1, window_bounds = array<i64: 4, 16, 16>}, {pipeline_mode = #tpu.pipeline_mode<synchronous>, transform_indices = @transform_2, window_bounds = array<i64: 16, 8>}, {transform_indices = @transform_3, window_bounds = array<i64: 4, 8, 8>}]} {
    %c0 = arith.constant 0 : index
    %c0_0 = arith.constant 0 : index
    %0 = vector.load %arg1[%c0, %c0_0] : memref<8x16xf32, #tpu.memory_space<vmem>>, vector<8x16xf32>
    %c0_1 = arith.constant 0 : index
    %c0_2 = arith.constant 0 : index
    %1 = vector.load %arg3[%c0_1, %c0_2] : memref<16x8xf32, #tpu.memory_space<vmem>>, vector<16x8xf32>
    %c0_3 = arith.constant 0 : index
    %c0_4 = arith.constant 0 : index
    %c0_5 = arith.constant 0 : index
    %2 = vector.load %arg2[%c0_3, %c0_4, %c0_5] : memref<4x16x16xf32, #tpu.memory_space<vmem>>, vector<4x16x16xf32>
    %3 = vector.shape_cast %0 : vector<8x16xf32> to vector<1x8x16xf32>
    %4 = vector.broadcast %3 : vector<1x8x16xf32> to vector<4x8x16xf32>
    "tpu.trace_start"() <{level = 10 : i32, message = "pij,pjk->pik"}> : () -> ()
    %cst = arith.constant dense<0.000000e+00> : vector<4x8x16xf32>
    %5 = tpu.matmul %4, %2, %cst {dimension_numbers = #tpu.dot_dimension_numbers<[2], [1], [1], [2], [0, 0, 0, 1, 1, 2], [0], [0]>} : vector<4x8x16xf32>, vector<4x16x16xf32>, vector<4x8x16xf32> -> vector<4x8x16xf32>
    "tpu.trace_stop"() : () -> ()
    %6 = vector.shape_cast %5 : vector<4x8x16xf32> to vector<32x16xf32>
    %cst_6 = arith.constant dense<0.000000e+00> : vector<32x8xf32>
    %7 = tpu.matmul %6, %1, %cst_6 {dimension_numbers = #tpu.dot_dimension_numbers<[1], [0], [0], [1], [0, 0, 1, 1], [], []>} : vector<32x16xf32>, vector<16x8xf32>, vector<32x8xf32> -> vector<32x8xf32>
    %8 = vector.shape_cast %7 : vector<32x8xf32> to vector<4x8x8xf32>
    %c0_7 = arith.constant 0 : index
    %c0_8 = arith.constant 0 : index
    %c0_9 = arith.constant 0 : index
    %9 = vector.load %arg4[%c0_7, %c0_8, %c0_9] : memref<4x8x8xf32, #tpu.memory_space<vmem>>, vector<4x8x8xf32>
    tpu.vector_store %arg4[%c0_7, %c0_8, %c0_9], %8 {strides = array<i32>} : memref<4x8x8xf32, #tpu.memory_space<vmem>>, vector<4x8x8xf32>,
    return
  }
  func.func @transform_0(%arg0: i32) -> (i32, i32) {
    %c0_i32 = arith.constant 0 : i32
    %c0_i32_0 = arith.constant 0 : i32
    %c0_i32_1 = arith.constant 0 : i32
    return %c0_i32, %c0_i32_0 : i32, i32
  }
  func.func @transform_1(%arg0: i32) -> (i32, i32, i32) {
    %c0_i32 = arith.constant 0 : i32
    %c0_i32_0 = arith.constant 0 : i32
    %c0_i32_1 = arith.constant 0 : i32
    return %arg0, %c0_i32, %c0_i32_0 : i32, i32, i32
  }
  func.func @transform_2(%arg0: i32) -> (i32, i32) {
    %c0_i32 = arith.constant 0 : i32
    %c0_i32_0 = arith.constant 0 : i32
    %c0_i32_1 = arith.constant 0 : i32
    return %c0_i32, %c0_i32_0 : i32, i32
  }
  func.func @transform_3(%arg0: i32) -> (i32, i32, i32) {
    %c0_i32 = arith.constant 0 : i32
    %c0_i32_0 = arith.constant 0 : i32
    %c0_i32_1 = arith.constant 0 : i32
    return %arg0, %c0_i32, %c0_i32_0 : i32, i32, i32
  }
}

module attributes {stable_mosaic.version = 11 : i64} {
  func.func @_conv1x1_kernel(%arg0: i32, %arg1: i32, %arg2: memref<1x4x64xf32, #tpu.memory_space<vmem>>, %arg3: memref<8x4xf32, #tpu.memory_space<vmem>>, %arg4: memref<8x1xf32, #tpu.memory_space<vmem>>, %arg5: memref<1x8x64xf32, #tpu.memory_space<vmem>>) attributes {dimension_semantics = [#tpu.dimension_semantics<parallel>, #tpu.dimension_semantics<parallel>], iteration_bounds = array<i64: 6, 1>, scalar_prefetch = 0 : i64, scratch_operands = 0 : i64, tpu.core_type = #tpu.core_type<tc>, window_params = [{transform_indices = @transform_0, window_bounds = array<i64: 1, 4, 64>}, {pipeline_mode = #tpu.pipeline_mode<synchronous>, transform_indices = @transform_1, window_bounds = array<i64: 8, 4>}, {pipeline_mode = #tpu.pipeline_mode<synchronous>, transform_indices = @transform_2, window_bounds = array<i64: 8, 1>}, {transform_indices = @transform_3, window_bounds = array<i64: 1, 8, 64>}]} {
    %c0 = arith.constant 0 : index
    %c0_0 = arith.constant 0 : index
    %0 = vector.load %arg3[%c0, %c0_0] : memref<8x4xf32, #tpu.memory_space<vmem>>, vector<8x4xf32>
    %c0_1 = arith.constant 0 : index
    %c0_2 = arith.constant 0 : index
    %c0_3 = arith.constant 0 : index
    %1 = vector.load %arg2[%c0_1, %c0_2, %c0_3] : memref<1x4x64xf32, #tpu.memory_space<vmem>>, vector<1x4x64xf32>
    %2 = vector.shape_cast %1 : vector<1x4x64xf32> to vector<4x64xf32>
    %cst = arith.constant dense<0.000000e+00> : vector<8x64xf32>
    %3 = tpu.matmul %0, %2, %cst {dimension_numbers = #tpu.dot_dimension_numbers<[1], [0], [0], [1], [0, 0, 1, 1], [], []>} : vector<8x4xf32>, vector<4x64xf32>, vector<8x64xf32> -> vector<8x64xf32>
    %c0_4 = arith.constant 0 : index
    %c0_5 = arith.constant 0 : index
    %4 = vector.load %arg4[%c0_4, %c0_5] : memref<8x1xf32, #tpu.memory_space<vmem>>, vector<8x1xf32>
    %5 = vector.broadcast %4 : vector<8x1xf32> to vector<8x64xf32>
    %6 = arith.addf %3, %5 : vector<8x64xf32>
    %c0_6 = arith.constant 0 : index
    %c0_7 = arith.constant 0 : index
    %c0_8 = arith.constant 0 : index
    %7 = vector.load %arg5[%c0_6, %c0_7, %c0_8] : memref<1x8x64xf32, #tpu.memory_space<vmem>>, vector<1x8x64xf32>
    %8 = vector.shape_cast %7 : vector<1x8x64xf32> to vector<8x64xf32>
    %9 = vector.shape_cast %6 : vector<8x64xf32> to vector<1x8x64xf32>
    tpu.vector_store %arg5[%c0_6, %c0_7, %c0_8], %9 {strides = array<i32>} : memref<1x8x64xf32, #tpu.memory_space<vmem>>, vector<1x8x64xf32>,
    return
  }
  func.func @transform_0(%arg0: i32, %arg1: i32) -> (i32, i32, i32) {
    %c0_i32 = arith.constant 0 : i32
    %c0_i32_0 = arith.constant 0 : i32
    return %arg0, %c0_i32, %arg1 : i32, i32, i32
  }
  func.func @transform_1(%arg0: i32, %arg1: i32) -> (i32, i32) {
    %c0_i32 = arith.constant 0 : i32
    %c0_i32_0 = arith.constant 0 : i32
    %c0_i32_1 = arith.constant 0 : i32
    return %c0_i32, %c0_i32_0 : i32, i32
  }
  func.func @transform_2(%arg0: i32, %arg1: i32) -> (i32, i32) {
    %c0_i32 = arith.constant 0 : i32
    %c0_i32_0 = arith.constant 0 : i32
    %c0_i32_1 = arith.constant 0 : i32
    return %c0_i32, %c0_i32_0 : i32, i32
  }
  func.func @transform_3(%arg0: i32, %arg1: i32) -> (i32, i32, i32) {
    %c0_i32 = arith.constant 0 : i32
    %c0_i32_0 = arith.constant 0 : i32
    return %arg0, %c0_i32, %arg1 : i32, i32, i32
  }
}

module attributes {stable_mosaic.version = 11 : i64} {
  func.func @_resize_kernel(%arg0: i32, %arg1: memref<16x8xf32, #tpu.memory_space<vmem>>, %arg2: memref<5x8x8xf32, #tpu.memory_space<vmem>>, %arg3: memref<8x16xf32, #tpu.memory_space<vmem>>, %arg4: memref<5x16x16xf32, #tpu.memory_space<vmem>>) attributes {dimension_semantics = [#tpu.dimension_semantics<parallel>], iteration_bounds = array<i64: 2>, scalar_prefetch = 0 : i64, scratch_operands = 0 : i64, tpu.core_type = #tpu.core_type<tc>, window_params = [{pipeline_mode = #tpu.pipeline_mode<synchronous>, transform_indices = @transform_0, window_bounds = array<i64: 16, 8>}, {transform_indices = @transform_1, window_bounds = array<i64: 5, 8, 8>}, {pipeline_mode = #tpu.pipeline_mode<synchronous>, transform_indices = @transform_2, window_bounds = array<i64: 8, 16>}, {transform_indices = @transform_3, window_bounds = array<i64: 5, 16, 16>}]} {
    %c0 = arith.constant 0 : index
    %c0_0 = arith.constant 0 : index
    %0 = vector.load %arg1[%c0, %c0_0] : memref<16x8xf32, #tpu.memory_space<vmem>>, vector<16x8xf32>
    %c0_1 = arith.constant 0 : index
    %c0_2 = arith.constant 0 : index
    %1 = vector.load %arg3[%c0_1, %c0_2] : memref<8x16xf32, #tpu.memory_space<vmem>>, vector<8x16xf32>
    %c0_3 = arith.constant 0 : index
    %c0_4 = arith.constant 0 : index
    %c0_5 = arith.constant 0 : index
    %2 = vector.load %arg2[%c0_3, %c0_4, %c0_5] : memref<5x8x8xf32, #tpu.memory_space<vmem>>, vector<5x8x8xf32>
    %3 = vector.shape_cast %0 : vector<16x8xf32> to vector<1x16x8xf32>
    %4 = vector.broadcast %3 : vector<1x16x8xf32> to vector<5x16x8xf32>
    "tpu.trace_start"() <{level = 10 : i32, message = "pij,pjk->pik"}> : () -> ()
    %cst = arith.constant dense<0.000000e+00> : vector<5x16x8xf32>
    %5 = tpu.matmul %4, %2, %cst {dimension_numbers = #tpu.dot_dimension_numbers<[2], [1], [1], [2], [0, 0, 0, 1, 1, 2], [0], [0]>} : vector<5x16x8xf32>, vector<5x8x8xf32>, vector<5x16x8xf32> -> vector<5x16x8xf32>
    "tpu.trace_stop"() : () -> ()
    %6 = vector.shape_cast %5 : vector<5x16x8xf32> to vector<80x8xf32>
    %cst_6 = arith.constant dense<0.000000e+00> : vector<80x16xf32>
    %7 = tpu.matmul %6, %1, %cst_6 {dimension_numbers = #tpu.dot_dimension_numbers<[1], [0], [0], [1], [0, 0, 1, 1], [], []>} : vector<80x8xf32>, vector<8x16xf32>, vector<80x16xf32> -> vector<80x16xf32>
    %8 = vector.shape_cast %7 : vector<80x16xf32> to vector<5x16x16xf32>
    %c0_7 = arith.constant 0 : index
    %c0_8 = arith.constant 0 : index
    %c0_9 = arith.constant 0 : index
    %9 = vector.load %arg4[%c0_7, %c0_8, %c0_9] : memref<5x16x16xf32, #tpu.memory_space<vmem>>, vector<5x16x16xf32>
    tpu.vector_store %arg4[%c0_7, %c0_8, %c0_9], %8 {strides = array<i32>} : memref<5x16x16xf32, #tpu.memory_space<vmem>>, vector<5x16x16xf32>,
    return
  }
  func.func @transform_0(%arg0: i32) -> (i32, i32) {
    %c0_i32 = arith.constant 0 : i32
    %c0_i32_0 = arith.constant 0 : i32
    %c0_i32_1 = arith.constant 0 : i32
    return %c0_i32, %c0_i32_0 : i32, i32
  }
  func.func @transform_1(%arg0: i32) -> (i32, i32, i32) {
    %c0_i32 = arith.constant 0 : i32
    %c0_i32_0 = arith.constant 0 : i32
    %c0_i32_1 = arith.constant 0 : i32
    return %arg0, %c0_i32, %c0_i32_0 : i32, i32, i32
  }
  func.func @transform_2(%arg0: i32) -> (i32, i32) {
    %c0_i32 = arith.constant 0 : i32
    %c0_i32_0 = arith.constant 0 : i32
    %c0_i32_1 = arith.constant 0 : i32
    return %c0_i32, %c0_i32_0 : i32, i32
  }
  func.func @transform_3(%arg0: i32) -> (i32, i32, i32) {
    %c0_i32 = arith.constant 0 : i32
    %c0_i32_0 = arith.constant 0 : i32
    %c0_i32_1 = arith.constant 0 : i32
    return %arg0, %c0_i32, %c0_i32_0 : i32, i32, i32
  }
}

module attributes {stable_mosaic.version = 11 : i64} {
  func.func @kernel(%arg0: i32, %arg1: i32, %arg2: memref<2x640xf32, #tpu.memory_space<vmem>>, %arg3: memref<2x640xf32, #tpu.memory_space<vmem>>, %arg4: memref<2x640xf32, #tpu.memory_space<vmem>>) attributes {dimension_semantics = [#tpu.dimension_semantics<parallel>, #tpu.dimension_semantics<parallel>], iteration_bounds = array<i64: 1, 2>, scalar_prefetch = 0 : i64, scratch_operands = 0 : i64, tpu.core_type = #tpu.core_type<tc>, window_params = [{transform_indices = @transform_0, window_bounds = array<i64: 2, 640>}, {transform_indices = @transform_1, window_bounds = array<i64: 2, 640>}, {transform_indices = @transform_2, window_bounds = array<i64: 2, 640>}]} {
    %c0 = arith.constant 0 : index
    %c0_0 = arith.constant 0 : index
    %0 = vector.load %arg2[%c0, %c0_0] : memref<2x640xf32, #tpu.memory_space<vmem>>, vector<2x640xf32>
    %c0_1 = arith.constant 0 : index
    %c0_2 = arith.constant 0 : index
    %1 = vector.load %arg3[%c0_1, %c0_2] : memref<2x640xf32, #tpu.memory_space<vmem>>, vector<2x640xf32>
    %2 = arith.addf %0, %1 : vector<2x640xf32>
    %c0_3 = arith.constant 0 : index
    %c0_4 = arith.constant 0 : index
    %3 = vector.load %arg4[%c0_3, %c0_4] : memref<2x640xf32, #tpu.memory_space<vmem>>, vector<2x640xf32>
    tpu.vector_store %arg4[%c0_3, %c0_4], %2 {strides = array<i32>} : memref<2x640xf32, #tpu.memory_space<vmem>>, vector<2x640xf32>,
    return
  }
  func.func @transform_0(%arg0: i32, %arg1: i32) -> (i32, i32) {
    %c0_i32 = arith.constant 0 : i32
    return %arg0, %arg1 : i32, i32
  }
  func.func @transform_1(%arg0: i32, %arg1: i32) -> (i32, i32) {
    %c0_i32 = arith.constant 0 : i32
    return %arg0, %arg1 : i32, i32
  }
  func.func @transform_2(%arg0: i32, %arg1: i32) -> (i32, i32) {
    %c0_i32 = arith.constant 0 : i32
    return %arg0, %arg1 : i32, i32
  }
}

</mosaic_0001>

<bundles_post_ra>
// kernel: forward.5
= control target key start
LH: loop header
LB: loop body
LE: loop exit
PB: predicated region body
PF: predicated region fallthrough
CT: control target
= control target key end

     0   :  { %s452_s12 = smov 0   ;;  %s454_s13 = smov 0   ;;  %s491_s0 = inlined_call_operand.vmem [shape: f32[54,4,64], index: 0, kind: input, shape index: {}]   ;;  %s492_s1 = inlined_call_operand.vmem [shape: f32[8,4], index: 1, kind: input, shape index: {}]   ;;  %s493_s2 = inlined_call_operand.vmem [shape: f32[8,1], index: 2, kind: input, shape index: {}]   ;;  %s494_s3 = inlined_call_operand.vmem [shape: f32[54,8,64], index: 3, kind: output, shape index: {}]  }
   0x1   :  { %s456_s14 = smov 0  }
   0x2 LB: > { %s25_s15 = sadd.s32 1, %s423_s13  ;;  %p363_p0 = scmp.ge.s32.totalorder %s427_s14, 1  ;;  %s427_s14 = sphi %s456_s14, %s13_s14   ;;  %s423_s13 = sphi %s454_s13, %s496_s13   ;;  %s419_s12 = sphi %s452_s12, %s495_s12  }
   0x3   : > { %p27_p1 = scmp.ge.s32.totalorder %s25_s15, 54  ;;  %p155_p2 = scmp.lt.s32.totalorder %s427_s14, 55 }
   0x5   : > { %s498_s15 = smov (%p27_p1, %s25_s15), 0  ;;  %p156_p3 = pnand %p363_p0, %p155_p2 }
   0x6   : > { %p183_p4 = scmp.lt.s32.totalorder (!%p156_p3), %s419_s12, 53 }
   0x7   : > { %159 = sbr.rel (%p156_p3) target bundleno = 213 (0xd5), region = 32 }
   0xc   : > { %v429_v0 = vmov 0.0   ;;  %vm430_vm0 = vmmov 0   ;;  %v199_v1 = vld [vmem:[%s493_s2] sm:$0xff]  ;;  %s500_s12 = smov (!%p183_p4, %s419_s12), 53  ;;  %v431_v2 = vmov 0   ;;  %vm209_vm1 = vcmask 1043456  }
   0xd   : > { %372 = vmatprep.subr.mxu0 %v429_v0  ;;  %374 = vmatprep.mubr.msk.f32.mxu0 %vm430_vm0, %v429_v0  ;;  %s364_s18 = sshll.u32 %s500_s12, 2  ;;  %v197_v3 = vld [vmem:[%s492_s1] sm:$0xff]  ;;  %vm205_vm2 = vcmask 31744   ;;  %s365_s24 = sshll.u32 %s500_s12, 3  ;;  %vm283_vm3 = vcmask 523264  }
   0xe   : > { %404 = vset.pattern.permute.xlu0 %v431_v2  ;;  %s189_s21 = scalar_lea.vmem %s491_s0, %s364_s18  ;;  %s196_s27 = scalar_lea.vmem %s494_s3, %s365_s24 }
   0xf   : > { %202 = vperm.xlu0 %404, %v199_v1   ;;  %v198_v4 = vld [vmem:[%s189_s21] sm:$0xf] }
  0x10   : > { %373 = vmatpush3.msk.msra.mxu0 %vm209_vm1, %v198_v4 }
  0x11   : > { %375 = vmatmul.mubr.msk.f32.vlgmr.msra.gmra.mxu0 %vm205_vm2, %v197_v3 }
  0x8a   : > { %v203_v5 = vpop.permute.xlu0 %202 }
  0xd1   : > { %v279_v6 = vpop.f32.mrf.mxu0 }
  0xd2   : > { %v280_v7 = vadd.f32 %v279_v6, %v203_v5 }
  0xd3   : > { %v376_v8 = vpop.f32.mrf.mxu0 }
  0xd4   : > { %284 = vst.msk [vmem:[%s196_s27] sm:$0xff] %vm283_vm3, %v280_v7 }
  0xd5 PF: > { %s13_s14 = sadd.s32 1, %s427_s14   ;;  %s495_s12 = smov %s423_s13 }
  0xd6   : > { %p10_p5 = scmp.ge.s32.totalorder %s13_s14, 56   ;;  %s496_s13 = smov %s498_s15 }
  0xd8   :  { %12 = sbr.rel (!%p10_p5) target bundleno = 2 (0x2), region = 62 }

// kernel: forward.6
= control target key start
LH: loop header
LB: loop body
LE: loop exit
PB: predicated region body
PF: predicated region fallthrough
CT: control target
= control target key end

     0   :  { %s747_s12 = smov 0   ;;  %s789_s0 = inlined_call_operand.vmem [shape: f32[8,16], index: 0, kind: input, shape index: {}]   ;;  %s790_s1 = inlined_call_operand.vmem [shape: f32[8,16,16], index: 1, kind: input, shape index: {}]   ;;  %s791_s2 = inlined_call_operand.vmem [shape: f32[16,8], index: 2, kind: input, shape index: {}]   ;;  %s792_s3 = inlined_call_operand.vmem [shape: f32[8,8,8], index: 3, kind: output, shape index: {}]  }
   0x1 LB: > { %s630_s13 = sadd.s32 4294967295, %s723_s12   ;;  %p634_p0 = scmp.ge.s32.totalorder %s723_s12, 1  ;;  %s723_s12 = sphi %s747_s12, %s13_s12  }
   0x2   : > { %p139_p1 = scmp.lt.s32.totalorder %s723_s12, 3 }
   0x4   : > { %p140_p2 = pnand %p634_p0, %p139_p1 }
   0x5   : > { %s635_s14 = sshll.u32 (!%p140_p2), %s630_s13, 2 }
   0x6   : > { %143 = sbr.rel (%p140_p2) target bundleno = 415 (0x19f), region = 32  ;;  %p165_p3 = scmp.lt.s32.totalorder (!%p140_p2), %s635_s14, 7 }
   0xb   : > { %v725_v0 = vmov 0.0   ;;  %vm726_vm0 = vmmov 0   ;;  %s794_s14 = smov (!%p165_p3, %s635_s14), 7  ;;  %v177_v3 = vld [vmem:[%s789_s0] sm:$0xff]  ;;  %vm188_vm1 = vcmask 130048   ;;  %v179_v10 = vld [vmem:[%s791_s2 + $0x8] sm:$0xff] }
   0xc   : > { %669 = vmatprep.subr.mxu1 %v725_v0  ;;  %673 = vmatprep.mubr.msk.f32.mxu1 %vm726_vm0, %v725_v0  ;;  %s650_s15 = sshll.u32 %s794_s14, 4  ;;  %v178_v11 = vld [vmem:[%s791_s2] sm:$0xff]  ;;  %s639_s25 = sshll.u32 %s794_s14, 3  ;;  %vm569_vm2 = vcmask 64512  }
   0xd   : > { %683 = vmatprep.subr.mxu0 %v725_v0  ;;  %687 = vmatprep.mubr.msk.f32.mxu0 %vm726_vm0, %v725_v0  ;;  %s169_s18 = scalar_lea.vmem %s790_s1, %s650_s15  ;;  %s175_s28 = scalar_lea.vmem %s792_s3, %s639_s25 }
   0xe   : > { %v181_v1 = vld [vmem:[%s169_s18 + $0x8] sm:$0xff]  ;;  %v180_v2 = vld [vmem:[%s169_s18] sm:$0xff]  ;;  %v183_v5 = vld [vmem:[%s169_s18 + $0x18] sm:$0xff] }
   0xf   : > { %670 = vmatpush3.msra.mxu1 %v181_v1  ;;  %v185_v4 = vld [vmem:[%s169_s18 + $0x28] sm:$0xff]  ;;  %v184_v6 = vld [vmem:[%s169_s18 + $0x20] sm:$0xff]  ;;  %v182_v7 = vld [vmem:[%s169_s18 + $0x10] sm:$0xff] }
  0x10   : > { %671 = vmatprep.subr.mxu1 %v725_v0  ;;  %684 = vmatpush3.msra.mxu0 %v185_v4  ;;  %v187_v8 = vld [vmem:[%s169_s18 + $0x38] sm:$0xff]  ;;  %v186_v9 = vld [vmem:[%s169_s18 + $0x30] sm:$0xff] }
  0x11   : > { %672 = vmatpush3.msra.mxu1 %v180_v2  ;;  %685 = vmatprep.subr.mxu0 %v725_v0 }
  0x12   : > { %674 = vmatmul.mubr.msk.f32.vlgmr.msra.gmra.mxu1 %vm188_vm1, %v177_v3  ;;  %676 = vmatprep.subr.mxu1 %v725_v0 }
  0x13   : > { %677 = vmatpush3.msra.mxu1 %v183_v5  ;;  %680 = vmatprep.mubr.msk.f32.mxu1 %vm726_vm0, %v725_v0 }
  0x14   : > { %678 = vmatprep.subr.mxu1 %v725_v0  ;;  %686 = vmatpush3.msra.mxu0 %v184_v6 }
  0x15   : > { %679 = vmatpush3.msra.mxu1 %v182_v7  ;;  %688 = vmatmul.mubr.msk.f32.vlgmr.msra.gmra.mxu0 %vm188_vm1, %v177_v3 }
  0x16   : > { %681 = vmatmul.mubr.msk.f32.vlgmr.msra.gmra.mxu1 %vm188_vm1, %v177_v3  ;;  %690 = vmatprep.subr.mxu1 %v725_v0 }
  0x17   : > { %691 = vmatpush3.msra.mxu1 %v187_v8  ;;  %694 = vmatprep.mubr.msk.f32.mxu1 %vm726_vm0, %v725_v0 }
  0x18   : > { %692 = vmatprep.subr.mxu1 %v725_v0  ;;  %697 = vmatprep.subr.mxu0 %v179_v10 }
  0x19   : > { %693 = vmatpush3.msra.mxu1 %v186_v9  ;;  %698 = vmatpush3.msra.mxu0 %v179_v10 }
  0x1a   : > { %695 = vmatmul.mubr.msk.f32.vlgmr.msra.gmra.mxu1 %vm188_vm1, %v177_v3  ;;  %699 = vmatprep.subr.mxu0 %v178_v11 }
  0x1b   : > { %700 = vmatpush3.msra.mxu0 %v178_v11 }
  0xd2   : > { %v258_v12 = vpop.f32.mrf.mxu1 }
  0xd3   : > { %701 = vmatprep.mubr.msk.f32.mxu0 %vm188_vm1, %v258_v12 }
  0xd4   : > { %v675_v13 = vpop.f32.mrf.mxu1 }
  0xd5   : > { %v398_v14 = vpop.f32.mrf.mxu0 }
  0xd6   : > { %v328_v15 = vpop.f32.mrf.mxu1 }
  0xd7   : > { %702 = vmatmul.mubr.msk.f32.vlgmr.msra.gmra.mxu0 %vm188_vm1, %v328_v15  ;;  %v689_v16 = vpop.f32.mrf.mxu0 }
  0xd8   : > { %v682_v17 = vpop.f32.mrf.mxu1  ;;  %704 = vmatprep.mubr.msk.f32.mxu0 %vm188_vm1, %v398_v14 }
  0xda   : > { %v468_v18 = vpop.f32.mrf.mxu1 }
  0xdb   : > { %705 = vmatmul.mubr.msk.f32.gmra.mxu0 %vm188_vm1, %v468_v18 }
  0xdc   : > { %v696_v19 = vpop.f32.mrf.mxu1 }
 0x197   : > { %v703_v20 = vpop.f32.mrf.mxu0 }
 0x198   : > { %571 = vst.msk [vmem:[%s175_s28 + $0x8] sm:$0xff] %vm569_vm2, %v703_v20 }
 0x199   : > { %v550_v21 = vpop.f32.mrf.mxu0 }
 0x19a   : > { %570 = vst.msk [vmem:[%s175_s28] sm:$0xff] %vm569_vm2, %v550_v21 }
 0x19b   : > { %v706_v22 = vpop.f32.mrf.mxu0 }
 0x19c   : > { %573 = vst.msk [vmem:[%s175_s28 + $0x18] sm:$0xff] %vm569_vm2, %v706_v22 }
 0x19d   : > { %v560_v23 = vpop.f32.mrf.mxu0 }
 0x19e   : > { %572 = vst.msk [vmem:[%s175_s28 + $0x10] sm:$0xff] %vm569_vm2, %v560_v23 }
 0x19f PF: > { %s13_s12 = sadd.s32 1, %s723_s12  }
 0x1a0   : > { %p10_p4 = scmp.ge.s32.totalorder %s13_s12, 4  }
 0x1a2   :  { %12 = sbr.rel (!%p10_p4) target bundleno = 1 (0x1), region = 62 }

// kernel: forward.7
= control target key start
LH: loop header
LB: loop body
LE: loop exit
PB: predicated region body
PF: predicated region fallthrough
CT: control target
= control target key end

     0   :  { %s452_s12 = smov 0   ;;  %s454_s13 = smov 0   ;;  %s491_s0 = inlined_call_operand.vmem [shape: f32[6,4,64], index: 0, kind: input, shape index: {}]   ;;  %s492_s1 = inlined_call_operand.vmem [shape: f32[8,4], index: 1, kind: input, shape index: {}]   ;;  %s493_s2 = inlined_call_operand.vmem [shape: f32[8,1], index: 2, kind: input, shape index: {}]   ;;  %s494_s3 = inlined_call_operand.vmem [shape: f32[6,8,64], index: 3, kind: output, shape index: {}]  }
   0x1   :  { %s456_s14 = smov 0  }
   0x2 LB: > { %s25_s15 = sadd.s32 1, %s423_s13  ;;  %p363_p0 = scmp.ge.s32.totalorder %s427_s14, 1  ;;  %s427_s14 = sphi %s456_s14, %s13_s14   ;;  %s423_s13 = sphi %s454_s13, %s496_s13   ;;  %s419_s12 = sphi %s452_s12, %s495_s12  }
   0x3   : > { %p27_p1 = scmp.ge.s32.totalorder %s25_s15, 6  ;;  %p155_p2 = scmp.lt.s32.totalorder %s427_s14, 7 }
   0x5   : > { %s498_s15 = smov (%p27_p1, %s25_s15), 0  ;;  %p156_p3 = pnand %p363_p0, %p155_p2 }
   0x6   : > { %p183_p4 = scmp.lt.s32.totalorder (!%p156_p3), %s419_s12, 5 }
   0x7   : > { %159 = sbr.rel (%p156_p3) target bundleno = 213 (0xd5), region = 32 }
   0xc   : > { %v429_v0 = vmov 0.0   ;;  %vm430_vm0 = vmmov 0   ;;  %v199_v1 = vld [vmem:[%s493_s2] sm:$0xff]  ;;  %s500_s12 = smov (!%p183_p4, %s419_s12), 5  ;;  %v431_v2 = vmov 0   ;;  %vm209_vm1 = vcmask 1043456  }
   0xd   : > { %372 = vmatprep.subr.mxu0 %v429_v0  ;;  %374 = vmatprep.mubr.msk.f32.mxu0 %vm430_vm0, %v429_v0  ;;  %s364_s18 = sshll.u32 %s500_s12, 2  ;;  %v197_v3 = vld [vmem:[%s492_s1] sm:$0xff]  ;;  %vm205_vm2 = vcmask 31744   ;;  %s365_s24 = sshll.u32 %s500_s12, 3  ;;  %vm283_vm3 = vcmask 523264  }
   0xe   : > { %404 = vset.pattern.permute.xlu0 %v431_v2  ;;  %s189_s21 = scalar_lea.vmem %s491_s0, %s364_s18  ;;  %s196_s27 = scalar_lea.vmem %s494_s3, %s365_s24 }
   0xf   : > { %202 = vperm.xlu0 %404, %v199_v1   ;;  %v198_v4 = vld [vmem:[%s189_s21] sm:$0xf] }
  0x10   : > { %373 = vmatpush3.msk.msra.mxu0 %vm209_vm1, %v198_v4 }
  0x11   : > { %375 = vmatmul.mubr.msk.f32.vlgmr.msra.gmra.mxu0 %vm205_vm2, %v197_v3 }
  0x8a   : > { %v203_v5 = vpop.permute.xlu0 %202 }
  0xd1   : > { %v279_v6 = vpop.f32.mrf.mxu0 }
  0xd2   : > { %v280_v7 = vadd.f32 %v279_v6, %v203_v5 }
  0xd3   : > { %v376_v8 = vpop.f32.mrf.mxu0 }
  0xd4   : > { %284 = vst.msk [vmem:[%s196_s27] sm:$0xff] %vm283_vm3, %v280_v7 }
  0xd5 PF: > { %s13_s14 = sadd.s32 1, %s427_s14   ;;  %s495_s12 = smov %s423_s13 }
  0xd6   : > { %p10_p5 = scmp.ge.s32.totalorder %s13_s14, 8   ;;  %s496_s13 = smov %s498_s15 }
  0xd8   :  { %12 = sbr.rel (!%p10_p5) target bundleno = 2 (0x2), region = 62 }

// kernel: forward.9
= control target key start
LH: loop header
LB: loop body
LE: loop exit
PB: predicated region body
PF: predicated region fallthrough
CT: control target
= control target key end

     0   :  { %s405_s9 = smov 0   ;;  %s407_s10 = smov 0   ;;  %s429_s0 = inlined_call_operand.vmem [shape: f32[2,1280], index: 0, kind: input, shape index: {}]   ;;  %s430_s1 = inlined_call_operand.vmem [shape: f32[2,1280], index: 1, kind: input, shape index: {}]   ;;  %s431_s2 = inlined_call_operand.vmem [shape: f32[2,1280], index: 2, kind: output, shape index: {}]  }
   0x1   :  { %s409_s11 = smov 0  }
   0x2 LB: > { %s21_s12 = sadd.s32 1, %s384_s10  ;;  %p336_p0 = scmp.ge.s32.totalorder %s388_s11, 1  ;;  %s388_s11 = sphi %s409_s11, %s12_s11   ;;  %s384_s10 = sphi %s407_s10, %s433_s10   ;;  %s380_s9 = sphi %s405_s9, %s432_s9  }
   0x3   : > { %p22_p1 = scmp.ge.s32.totalorder %s21_s12, 2  ;;  %p150_p2 = scmp.lt.s32.totalorder %s388_s11, 3 }
   0x5   : > { %s435_s12 = smov (%p22_p1, %s21_s12), 0  ;;  %p151_p3 = pnand %p336_p0, %p150_p2 }
   0x6   : > { %s189_s13 = smul.u32 (!%p151_p3), 5, %s380_s9 }
   0x7   : > { %154 = sbr.rel (%p151_p3) target bundleno = 20 (0x14), region = 28 }
   0x8   : > { %p192_p4 = scmp.lt.s32.totalorder (!%p151_p3), %s189_s13, 9 }
   0xc   : > { %s437_s13 = smov (!%p192_p4, %s189_s13), 9 }
   0xd   : > { %s337_s14 = sshll.u32 %s437_s13, 1 }
   0xe   : > { %s197_s17 = scalar_lea.vmem %s429_s0, %s337_s14  ;;  %s207_s20 = scalar_lea.vmem %s430_s1, %s337_s14 }
   0xf   : > { %s217_s23 = scalar_lea.vmem %s431_s2, %s337_s14  ;;  %v219_v0 = vld [vmem:[%s197_s17] sm:$0xff]  ;;  %v220_v2 = vld [vmem:[%s197_s17 + $0x8] sm:$0x3] }
  0x10   : > { %v221_v1 = vld [vmem:[%s207_s20] sm:$0xff]  ;;  %v222_v4 = vld [vmem:[%s207_s20 + $0x8] sm:$0x3] }
  0x11   : > { %v223_v3 = vadd.f32 %v221_v1, %v219_v0  ;;  %v224_v5 = vadd.f32 %v222_v4, %v220_v2 }
  0x13   : > { %225 = vst [vmem:[%s217_s23] sm:$0xff] %v223_v3  ;;  %226 = vst [vmem:[%s217_s23 + $0x8] sm:$0x3] %v224_v5 }
  0x14 PF: > { %s12_s11 = sadd.s32 1, %s388_s11   ;;  %s432_s9 = smov %s384_s10 }
  0x15   : > { %p9_p5 = scmp.ge.s32.totalorder %s12_s11, 4   ;;  %s433_s10 = smov %s435_s12 }
  0x17   :  { %11 = sbr.rel (!%p9_p5) target bundleno = 2 (0x2), region = 61 }

// kernel: forward.8
= control target key start
LH: loop header
LB: loop body
LE: loop exit
PB: predicated region body
PF: predicated region fallthrough
CT: control target
= control target key end

     0   :  { %s917_s12 = smov 0   ;;  %s977_s0 = inlined_call_operand.vmem [shape: f32[16,8], index: 0, kind: input, shape index: {}]   ;;  %s978_s1 = inlined_call_operand.vmem [shape: f32[10,8,8], index: 1, kind: input, shape index: {}]   ;;  %s979_s2 = inlined_call_operand.vmem [shape: f32[8,16], index: 2, kind: input, shape index: {}]   ;;  %s980_s3 = inlined_call_operand.vmem [shape: f32[10,16,16], index: 3, kind: output, shape index: {}]  }
   0x1 LB: > { %s780_s13 = sadd.s32 4294967295, %s895_s12   ;;  %p784_p0 = scmp.ge.s32.totalorder %s895_s12, 1  ;;  %s895_s12 = sphi %s917_s12, %s13_s12  }
   0x2   : > { %p138_p1 = scmp.lt.s32.totalorder %s895_s12, 3 }
   0x4   : > { %p139_p2 = pnand %p784_p0, %p138_p1 }
   0x5   : > { %s163_s14 = smul.u32 (!%p139_p2), 5, %s780_s13 }
   0x6   : > { %142 = sbr.rel (%p139_p2) target bundleno = 421 (0x1a5), region = 32 }
   0x7   : > { %p164_p3 = scmp.lt.s32.totalorder (!%p139_p2), %s163_s14, 9 }
   0xb   : > { %v176_v0 = vld [vmem:[%s977_s0] sm:$0xff]  ;;  %vm184_vm0 = vcmask 64512   ;;  %s982_s14 = smov (!%p164_p3, %s163_s14), 9  ;;  %v177_v1 = vld [vmem:[%s977_s0 + $0x8] sm:$0xff]  ;;  %vm711_vm1 = vcmask 130048  }
   0xc   : > { %839 = vmatprep.mubr.msk.f32.mxu0 %vm184_vm0, %v176_v0  ;;  %844 = vmatprep.mubr.msk.f32.mxu1 %vm184_vm0, %v176_v0  ;;  %s785_s17 = sshll.u32 %s982_s14, 3  ;;  %v178_v7 = vld [vmem:[%s979_s2] sm:$0xff]  ;;  %s810_s25 = sshll.u32 %s982_s14, 4 }
   0xd   : > { %s167_s20 = scalar_lea.vmem %s978_s1, %s785_s17  ;;  %s174_s28 = scalar_lea.vmem %s980_s3, %s810_s25 }
   0xe   : > { %v179_v2 = vld [vmem:[%s167_s20] sm:$0xff]  ;;  %v181_v3 = vld [vmem:[%s167_s20 + $0x10] sm:$0xff]  ;;  %v180_v4 = vld [vmem:[%s167_s20 + $0x8] sm:$0xff] }
   0xf   : > { %837 = vmatprep.subr.mxu0 %v179_v2  ;;  %842 = vmatprep.subr.mxu1 %v180_v4  ;;  %v182_v5 = vld [vmem:[%s167_s20 + $0x18] sm:$0xff]  ;;  %v183_v6 = vld [vmem:[%s167_s20 + $0x20] sm:$0xff] }
  0x10   : > { %838 = vmatpush3.msra.mxu0 %v179_v2  ;;  %843 = vmatpush3.msra.mxu1 %v180_v4 }
  0x11   : > { %840 = vmatmul.mubr.msk.f32.vlgmr.msra.gmra.mxu0 %vm184_vm0, %v177_v1  ;;  %847 = vmatprep.subr.mxu0 %v181_v3 }
  0x12   : > { %848 = vmatpush3.msra.mxu0 %v181_v3  ;;  %845 = vmatmul.mubr.msk.f32.vlgmr.msra.gmra.mxu1 %vm184_vm0, %v177_v1 }
  0x13   : > { %849 = vmatprep.mubr.msk.f32.mxu0 %vm184_vm0, %v176_v0  ;;  %852 = vmatprep.subr.mxu1 %v182_v5 }
  0x14   : > { %853 = vmatpush3.msra.mxu1 %v182_v5  ;;  %854 = vmatprep.mubr.msk.f32.mxu1 %vm184_vm0, %v176_v0 }
  0x15   : > { %850 = vmatmul.mubr.msk.f32.vlgmr.msra.gmra.mxu0 %vm184_vm0, %v177_v1  ;;  %857 = vmatprep.subr.mxu0 %v183_v6 }
  0x16   : > { %855 = vmatmul.mubr.msk.f32.vlgmr.msra.gmra.mxu1 %vm184_vm0, %v177_v1  ;;  %858 = vmatpush3.msra.mxu0 %v183_v6 }
  0x17   : > { %859 = vmatprep.mubr.msk.f32.mxu0 %vm184_vm0, %v176_v0  ;;  %862 = vmatprep.subr.mxu0 %v178_v7 }
  0x18   : > { %879 = vmatprep.subr.mxu1 %v178_v7 }
  0x19   : > { %860 = vmatmul.mubr.msk.f32.vlgmr.msra.gmra.mxu0 %vm184_vm0, %v177_v1  ;;  %880 = vmatpush3.msra.mxu1 %v178_v7 }
  0x1a   : > { %863 = vmatpush3.msra.mxu0 %v178_v7 }
  0xd1   : > { %v841_v8 = vpop.f32.mrf.mxu0 }
  0xd2   : > { %v846_v9 = vpop.f32.mrf.mxu1 }
  0xd3   : > { %v257_v10 = vpop.f32.mrf.mxu0 }
  0xd4   : > { %864 = vmatprep.mubr.msk.f32.mxu0 %vm184_vm0, %v257_v10  ;;  %v332_v11 = vpop.f32.mrf.mxu1 }
  0xd5   : > { %v851_v12 = vpop.f32.mrf.mxu0  ;;  %865 = vmatmul.mubr.msk.f32.vlgmr.msra.gmra.mxu0 %vm184_vm0, %v841_v8 }
  0xd6   : > { %867 = vmatprep.mubr.msk.f32.mxu0 %vm184_vm0, %v332_v11  ;;  %v856_v13 = vpop.f32.mrf.mxu1 }
  0xd7   : > { %v407_v14 = vpop.f32.mrf.mxu0 }
  0xd8   : > { %870 = vmatprep.mubr.msk.f32.mxu1 %vm184_vm0, %v407_v14  ;;  %v482_v15 = vpop.f32.mrf.mxu1 }
  0xd9   : > { %868 = vmatmul.mubr.msk.f32.gmra.mxu0 %vm184_vm0, %v846_v9  ;;  %871 = vmatmul.mubr.msk.f32.vlgmr.msra.gmra.mxu1 %vm184_vm0, %v851_v12  ;;  %v861_v16 = vpop.f32.mrf.mxu0 }
  0xda   : > { %873 = vmatprep.mubr.msk.f32.mxu1 %vm184_vm0, %v482_v15 }
  0xdb   : > { %v557_v17 = vpop.f32.mrf.mxu0 }
  0xdd   : > { %874 = vmatmul.mubr.msk.f32.gmra.mxu1 %vm184_vm0, %v856_v13 }
  0xde   : > { %876 = vmatprep.mubr.msk.f32.mxu1 %vm184_vm0, %v557_v17 }
  0xe1   : > { %877 = vmatmul.mubr.msk.f32.gmra.mxu1 %vm184_vm0, %v861_v16 }
 0x195   : > { %v866_v18 = vpop.f32.mrf.mxu0 }
 0x196   : > { %713 = vst.msk [vmem:[%s174_s28 + $0x8] sm:$0xff] %vm711_vm1, %v866_v18 }
 0x197   : > { %v662_v19 = vpop.f32.mrf.mxu0 }
 0x198   : > { %712 = vst.msk [vmem:[%s174_s28] sm:$0xff] %vm711_vm1, %v662_v19 }
 0x199   : > { %v869_v20 = vpop.f32.mrf.mxu0  ;;  %v872_v21 = vpop.f32.mrf.mxu1 }
 0x19a   : > { %715 = vst.msk [vmem:[%s174_s28 + $0x18] sm:$0xff] %vm711_vm1, %v869_v20  ;;  %717 = vst.msk [vmem:[%s174_s28 + $0x28] sm:$0xff] %vm711_vm1, %v872_v21 }
 0x19b   : > { %v672_v22 = vpop.f32.mrf.mxu0  ;;  %v682_v23 = vpop.f32.mrf.mxu1 }
 0x19c   : > { %714 = vst.msk [vmem:[%s174_s28 + $0x10] sm:$0xff] %vm711_vm1, %v672_v22  ;;  %716 = vst.msk [vmem:[%s174_s28 + $0x20] sm:$0xff] %vm711_vm1, %v682_v23 }
 0x19d   : > { %v875_v24 = vpop.f32.mrf.mxu1 }
 0x19e   : > { %719 = vst.msk [vmem:[%s174_s28 + $0x38] sm:$0xff] %vm711_vm1, %v875_v24 }
 0x19f   : > { %v692_v25 = vpop.f32.mrf.mxu1 }
 0x1a0   : > { %718 = vst.msk [vmem:[%s174_s28 + $0x30] sm:$0xff] %vm711_vm1, %v692_v25 }
 0x1a1   : > { %v878_v26 = vpop.f32.mrf.mxu1 }
 0x1a2   : > { %721 = vst.msk [vmem:[%s174_s28 + $0x48] sm:$0xff] %vm711_vm1, %v878_v26 }
 0x1a3   : > { %v702_v27 = vpop.f32.mrf.mxu1 }
 0x1a4   : > { %720 = vst.msk [vmem:[%s174_s28 + $0x40] sm:$0xff] %vm711_vm1, %v702_v27 }
 0x1a5 PF: > { %s13_s12 = sadd.s32 1, %s895_s12  }
 0x1a6   : > { %p10_p4 = scmp.ge.s32.totalorder %s13_s12, 4  }
 0x1a8   :  { %12 = sbr.rel (!%p10_p4) target bundleno = 1 (0x1), region = 62 }

</bundles_post_ra>
